<compile_context>
chip_gen: v5e
topology: v5e:2x2
jax: 0.10.0
libtpu: 0.0.40
codegen_flags: <defaults>
</compile_context>

<pallas_src>
import math
import numpy as np
import jax
import jax.numpy as jnp
from jax.experimental import pallas as pl
from jax.experimental.pallas import tpu as pltpu

# ---------------------------------------------------------------------------
# Scaled-down module constants (real module: n_fft=4096, n_mels=256, emb=4096)
# ---------------------------------------------------------------------------
SAMPLE_RATE = 44100
N_FFT = 256
N_FREQS = N_FFT // 2 + 1          # one-sided rfft bins (129)
N_FREQS_KEEP = N_FFT // 2         # 128: bins 1..N/2 kept, DC dropped (mel weight is exactly 0)
N_MELS = 64
EMBEDDING_SIZE = 512
EPSILON = 1e-4


# ---------------------------------------------------------------------------
# Deterministic parameter / buffer construction (module __init__ equivalent)
# ---------------------------------------------------------------------------
def _mel_filterbank(sr, n_fft, n_mels, fmin=0.0, fmax=None):
    # librosa.filters.mel equivalent (Slaney triangles + slaney norm): (n_mels, 1+n_fft//2)
    if fmax is None:
        fmax = sr / 2.0
    hz_to_mel = lambda f: 2595.0 * np.log10(1.0 + np.asarray(f, np.float64) / 700.0)
    mel_to_hz = lambda m: 700.0 * (10.0 ** (np.asarray(m, np.float64) / 2595.0) - 1.0)
    n_freqs = n_fft // 2 + 1
    fftfreqs = np.linspace(0.0, sr / 2.0, n_freqs)
    mel_pts = np.linspace(hz_to_mel(fmin), hz_to_mel(fmax), n_mels + 2)
    hz_pts = mel_to_hz(mel_pts)
    fdiff = np.diff(hz_pts)
    ramps = hz_pts[:, None] - fftfreqs[None, :]
    lower = -ramps[:-2] / fdiff[:-1, None]
    upper = ramps[2:] / fdiff[1:, None]
    weights = np.maximum(0.0, np.minimum(lower, upper))
    enorm = 2.0 / (hz_pts[2 : n_mels + 2] - hz_pts[:n_mels])
    weights *= enorm[:, None]
    return weights.astype(np.float32)


def build_params():
    # Hann window (periodic, matching torch.hann_window default)
    n = np.arange(N_FFT, dtype=np.float64)
    window = 0.5 - 0.5 * np.cos(2.0 * np.pi * n / N_FFT)

    mel = _mel_filterbank(SAMPLE_RATE, N_FFT, N_MELS)            # (N_MELS, N_FREQS)
    # Exactness precondition for dropping the DC bin from the packed basis / mel rows:
    # with Slaney triangles and fmin=0 / fmax=sr/2, every filter's weight at bin 0 is
    # exactly zero. Assert so a future fmin/fmax change cannot silently break this.
    assert np.all(mel[:, 0] == 0.0), "DC-bin mel weights must be exactly zero"
    # (The Nyquist bin N/2 is *kept* in the packing, so no assumption is needed there.)

    # Real-DFT basis for bins 1..N/2 with the window folded in:
    #   rfft(w*x)[k] = sum_n x[n] * w[n] * (cos - j sin)(2*pi*n*k/N)
    k = np.arange(1, N_FREQS_KEEP + 1, dtype=np.float64)          # bins 1..128
    ang = 2.0 * np.pi * np.outer(n, k) / N_FFT                    # (N_FFT, 128)
    cos_m = np.cos(ang) * window[:, None]
    sin_m = -np.sin(ang) * window[:, None]
    # Single concatenated [cos | -sin] basis, lane-dense (2*128 = 256 columns).
    basis = np.concatenate([cos_m, sin_m], axis=1)                 # (N_FFT, 2*N_FREQS_KEEP)

    # mel_scale buffer restricted to bins 1..N/2, pre-transposed -> (128, N_MELS), f32.
    mel_t = np.ascontiguousarray(mel[:, 1 : N_FREQS_KEEP + 1].T).astype(np.float32)

    # projection parameter ~ U[0,1) / sqrt(n_mels)   (torch.rand(...) / sqrt(n_mels))
    proj_f32 = jax.random.uniform(
        jax.random.PRNGKey(42), (N_MELS, EMBEDDING_SIZE), dtype=jnp.float32
    ) / math.sqrt(N_MELS)

    return {
        # kernel weights: bf16 for the MXU matmuls, f32 for the mel contraction
        "basis": jnp.asarray(basis, dtype=jnp.bfloat16),
        "mel_t": jnp.asarray(mel_t),                               # f32 on purpose
        "proj": proj_f32.astype(jnp.bfloat16),
        # f32 copies for the pure-JAX reference
        "window_f32": jnp.asarray(window.astype(np.float32)),
        "mel_t_f32": jnp.asarray(mel.T.copy()),
        "proj_f32": proj_f32,
    }


# ---------------------------------------------------------------------------
# Pallas kernel: fused (windowed real-DFT) -> power -> mel -> log -> projection
# ---------------------------------------------------------------------------
def _mel_embed_kernel(x_ref, basis_ref, melT_ref, proj_ref, out_ref):
    # x tile -> bf16 operands, f32 accumulation on the MXU.
    xb = x_ref[...].astype(jnp.bfloat16)

    # One wide matmul gives [re(bins 1..N/2) | im(bins 1..N/2)]: (TB, 2*N_FREQS_KEEP).
    y = jnp.dot(xb, basis_ref[...], preferred_element_type=jnp.float32)
    re = y[:, :N_FREQS_KEEP]                                      # 128-aligned slices
    im = y[:, N_FREQS_KEEP:]
    power = re * re + im * im                                     # |rfft|^2, bins 1..N/2

    # power -> mel stays fully f32 (large dynamic range; K=128 keeps this matmul cheap).
    mel = jnp.dot(power, melT_ref[...], preferred_element_type=jnp.float32)
    logmel = jnp.log(mel + EPSILON)

    emb = jnp.dot(logmel.astype(jnp.bfloat16), proj_ref[...],
                  preferred_element_type=jnp.float32)             # (TB, EMBEDDING_SIZE)
    out_ref[...] = emb.astype(out_ref.dtype)


def random_projection_mel_embedding(x, basis, mel_t, proj, *, tb=None,
                                    out_dtype=jnp.bfloat16,
                                    single_buffer_weights=False):
    B, n = x.shape
    assert n == N_FFT

    if tb is None:
        # Adaptive batch tile: no 8x padding waste at small B. For large B on v6e/v7x
        # consider tb=256 (fills the 256-row MXU, halves per-step overhead); on v5e
        # (128-wide MXU) 128 is already optimal.
        tb = min(128, ((B + 15) // 16) * 16)

    Bp = pl.cdiv(B, tb) * tb
    if Bp != B:
        # TODO(synk): for large ragged B prefer B % tb == 0 upstream (or a masked tail
        # tile) -- this pad is an extra HBM read+write of x on an HBM-bound kernel.
        x = jnp.pad(x, ((0, Bp - B), (0, 0)))

    # Constant weights (index_map is always (0,0)) are resident across the grid.
    # Single-buffer them at the real config (v7x 64 MiB/TC VMEM, v5e/v6e scoped limits);
    # immaterial at demo scale (<0.3 MiB total), so off by default.
    wkw = dict(pipeline_mode=pl.Buffered(1)) if single_buffer_weights else {}

    flops = 2 * Bp * (N_FFT * 2 * N_FREQS_KEEP
                      + N_FREQS_KEEP * N_MELS
                      + N_MELS * EMBEDDING_SIZE)
    bytes_accessed = (x.size * x.dtype.itemsize
                      + basis.size * basis.dtype.itemsize
                      + mel_t.size * mel_t.dtype.itemsize
                      + proj.size * proj.dtype.itemsize
                      + Bp * EMBEDDING_SIZE * np.dtype(out_dtype).itemsize)

    out = pl.pallas_call(
        _mel_embed_kernel,
        out_shape=jax.ShapeDtypeStruct((Bp, EMBEDDING_SIZE), out_dtype),
        grid_spec=pltpu.PrefetchScalarGridSpec(
            num_scalar_prefetch=0,
            grid=(Bp // tb,),
            in_specs=[
                pl.BlockSpec((tb, N_FFT), lambda i: (i, 0)),                     # x batch tile
                pl.BlockSpec((N_FFT, 2 * N_FREQS_KEEP), lambda i: (0, 0), **wkw),  # [cos|-sin]*window
                pl.BlockSpec((N_FREQS_KEEP, N_MELS), lambda i: (0, 0), **wkw),     # mel_scale^T (f32)
                pl.BlockSpec((N_MELS, EMBEDDING_SIZE), lambda i: (0, 0), **wkw),   # projection
            ],
            out_specs=pl.BlockSpec((tb, EMBEDDING_SIZE), lambda i: (i, 0)),
        ),
        compiler_params=pltpu.CompilerParams(
            dimension_semantics=("parallel",)),
        cost_estimate=pl.CostEstimate(
            flops=int(flops),
            transcendentals=int(Bp * N_MELS),
            bytes_accessed=int(bytes_accessed)),
    )(x, basis, mel_t, proj)
    return out[:B]


# ---------------------------------------------------------------------------
# Pure-JAX reference (real FFT, f32 weights) for correctness checking
# ---------------------------------------------------------------------------
def reference(x, window, mel_t_f32, proj_f32):
    xf = jnp.fft.rfft(x * window)
    power = (jnp.abs(xf) ** 2.0).astype(jnp.float32)
    mel = power @ mel_t_f32
    return jnp.log(mel + EPSILON) @ proj_f32


if __name__ == "__main__":
    B = 16
    x = jax.random.normal(jax.random.PRNGKey(0), (B, N_FFT), dtype=jnp.float32)
    params = build_params()

    out = random_projection_mel_embedding(
        x, params["basis"], params["mel_t"], params["proj"])
    out = jax.block_until_ready(out)

    ref = reference(x, params["window_f32"], params["mel_t_f32"], params["proj_f32"])
    assert out.shape == (B, EMBEDDING_SIZE)
    # Tolerance accounts for bf16 DFT/projection operands and the bf16 output store
    # (all accumulation stays f32; the power->mel contraction is fully f32).
    np.testing.assert_allclose(np.asarray(out.astype(jnp.float32)), np.asarray(ref),
                               rtol=3e-2, atol=5e-2)
    print("KERNEL_OK")
</pallas_src>

<mosaic_0001>
module attributes {stable_mosaic.version = 11 : i64} {
  func.func @_mel_embed_kernel(%arg0: i32, %arg1: memref<16x256xf32, #tpu.memory_space<vmem>>, %arg2: memref<256x256xbf16, #tpu.memory_space<vmem>>, %arg3: memref<128x64xf32, #tpu.memory_space<vmem>>, %arg4: memref<64x512xbf16, #tpu.memory_space<vmem>>, %arg5: memref<16x512xbf16, #tpu.memory_space<vmem>>) attributes {dimension_semantics = [#tpu.dimension_semantics<parallel>], iteration_bounds = array<i64: 1>, scalar_prefetch = 0 : i64, scratch_operands = 0 : i64, tpu.core_type = #tpu.core_type<tc>, window_params = [{transform_indices = @transform_0, window_bounds = array<i64: 16, 256>}, {pipeline_mode = #tpu.pipeline_mode<synchronous>, transform_indices = @transform_1, window_bounds = array<i64: 256, 256>}, {pipeline_mode = #tpu.pipeline_mode<synchronous>, transform_indices = @transform_2, window_bounds = array<i64: 128, 64>}, {pipeline_mode = #tpu.pipeline_mode<synchronous>, transform_indices = @transform_3, window_bounds = array<i64: 64, 512>}, {transform_indices = @transform_4, window_bounds = array<i64: 16, 512>}]} {
    %c0 = arith.constant 0 : index
    %c0_0 = arith.constant 0 : index
    %0 = vector.load %arg1[%c0, %c0_0] : memref<16x256xf32, #tpu.memory_space<vmem>>, vector<16x256xf32>
    %1 = arith.truncf %0 : vector<16x256xf32> to vector<16x256xbf16>
    %c0_1 = arith.constant 0 : index
    %c0_2 = arith.constant 0 : index
    %2 = vector.load %arg2[%c0_1, %c0_2] : memref<256x256xbf16, #tpu.memory_space<vmem>>, vector<256x256xbf16>
    %cst = arith.constant dense<0.000000e+00> : vector<16x256xf32>
    %3 = tpu.matmul %1, %2, %cst {dimension_numbers = #tpu.dot_dimension_numbers<[1], [0], [0], [1], [0, 0, 1, 1], [], []>} : vector<16x256xbf16>, vector<256x256xbf16>, vector<16x256xf32> -> vector<16x256xf32>
    %4 = vector.extract_strided_slice %3 {offsets = [0, 0], sizes = [16, 128], strides = [1, 1]} : vector<16x256xf32> to vector<16x128xf32>
    %5 = vector.extract_strided_slice %3 {offsets = [0, 128], sizes = [16, 128], strides = [1, 1]} : vector<16x256xf32> to vector<16x128xf32>
    %6 = arith.mulf %4, %4 : vector<16x128xf32>
    %7 = arith.mulf %5, %5 : vector<16x128xf32>
    %8 = arith.addf %6, %7 : vector<16x128xf32>
    %c0_3 = arith.constant 0 : index
    %c0_4 = arith.constant 0 : index
    %9 = vector.load %arg3[%c0_3, %c0_4] : memref<128x64xf32, #tpu.memory_space<vmem>>, vector<128x64xf32>
    %cst_5 = arith.constant dense<0.000000e+00> : vector<16x64xf32>
    %10 = tpu.matmul %8, %9, %cst_5 {dimension_numbers = #tpu.dot_dimension_numbers<[1], [0], [0], [1], [0, 0, 1, 1], [], []>} : vector<16x128xf32>, vector<128x64xf32>, vector<16x64xf32> -> vector<16x64xf32>
    %cst_6 = arith.constant 9.99999974E-5 : f32
    %11 = vector.broadcast %cst_6 : f32 to vector<16x64xf32>
    %12 = arith.addf %10, %11 : vector<16x64xf32>
    %13 = math.log %12 : vector<16x64xf32>
    %14 = arith.truncf %13 : vector<16x64xf32> to vector<16x64xbf16>
    %c0_7 = arith.constant 0 : index
    %c0_8 = arith.constant 0 : index
    %15 = vector.load %arg4[%c0_7, %c0_8] : memref<64x512xbf16, #tpu.memory_space<vmem>>, vector<64x512xbf16>
    %cst_9 = arith.constant dense<0.000000e+00> : vector<16x512xf32>
    %16 = tpu.matmul %14, %15, %cst_9 {dimension_numbers = #tpu.dot_dimension_numbers<[1], [0], [0], [1], [0, 0, 1, 1], [], []>} : vector<16x64xbf16>, vector<64x512xbf16>, vector<16x512xf32> -> vector<16x512xf32>
    %17 = arith.truncf %16 : vector<16x512xf32> to vector<16x512xbf16>
    %c0_10 = arith.constant 0 : index
    %c0_11 = arith.constant 0 : index
    %18 = vector.load %arg5[%c0_10, %c0_11] : memref<16x512xbf16, #tpu.memory_space<vmem>>, vector<16x512xbf16>
    tpu.vector_store %arg5[%c0_10, %c0_11], %17 {strides = array<i32>} : memref<16x512xbf16, #tpu.memory_space<vmem>>, vector<16x512xbf16>,
    return
  }
  func.func @transform_0(%arg0: i32) -> (i32, i32) {
    %c0_i32 = arith.constant 0 : i32
    %c0_i32_0 = arith.constant 0 : i32
    return %arg0, %c0_i32 : i32, i32
  }
  func.func @transform_1(%arg0: i32) -> (i32, i32) {
    %c0_i32 = arith.constant 0 : i32
    %c0_i32_0 = arith.constant 0 : i32
    %c0_i32_1 = arith.constant 0 : i32
    return %c0_i32, %c0_i32_0 : i32, i32
  }
  func.func @transform_2(%arg0: i32) -> (i32, i32) {
    %c0_i32 = arith.constant 0 : i32
    %c0_i32_0 = arith.constant 0 : i32
    %c0_i32_1 = arith.constant 0 : i32
    return %c0_i32, %c0_i32_0 : i32, i32
  }
  func.func @transform_3(%arg0: i32) -> (i32, i32) {
    %c0_i32 = arith.constant 0 : i32
    %c0_i32_0 = arith.constant 0 : i32
    %c0_i32_1 = arith.constant 0 : i32
    return %c0_i32, %c0_i32_0 : i32, i32
  }
  func.func @transform_4(%arg0: i32) -> (i32, i32) {
    %c0_i32 = arith.constant 0 : i32
    %c0_i32_0 = arith.constant 0 : i32
    return %arg0, %c0_i32 : i32, i32
  }
}

</mosaic_0001>

<bundles_post_ra>
// kernel: tpu_custom_call.1
= control target key start
LH: loop header
LB: loop body
LE: loop exit
PB: predicated region body
PF: predicated region fallthrough
CT: control target
= control target key end

     0   :  { %9 = vsyncpa [#allocation3], 0  ;;  %s1021_s0 = inlined_call_operand.vmem [shape: f32[16,256], index: 0, kind: input, shape index: {}]   ;;  %s1022_s1 = inlined_call_operand.hbm [shape: bf16[256,256], index: 1, kind: input, shape index: {}]   ;;  %s1023_s2 = inlined_call_operand.vmem [shape: f32[128,64], index: 2, kind: input, shape index: {}]   ;;  %s1024_s3 = inlined_call_operand.vmem [shape: bf16[64,512], index: 3, kind: input, shape index: {}]   ;;  %s1025_s4 = inlined_call_operand.hbm [shape: bf16[16,512], index: 4, kind: output, shape index: {}]  }
   0x1   :  { %10 = vsyncpa [#allocation4], 0  ;;  %s17_s17 = sshll.u32 %s1022_s1, 4  ;;  %s828_s18 = smov [#allocation2]   ;;  %s18_s17 = int_to_ptr.hbm [resolvable:$true] %s17_s17 }
   0x2   :  { %s19_s19 = sshll.u32 %s828_s18, 4  ;;  %s829_s20 = smov 128   ;;  %s20_s19 = int_to_ptr.vmem [resolvable:$true] %s19_s19 }
   0x3   :  { %s830_s21 = smov 8  }
   0x4   :  { %25 = dma.hbm_to_vmem [thread:$0]  %s18_s17, 4096, %s20_s19, [#allocation3], %s829_s20, %s829_s20, %s830_s21  }
   0x5   :  { %824 = dma.done.wait [#allocation3], 4096  }
   0x6   :  { %825 = vsyncadd [#allocation3], 4294963200  ;;  %v580_v0 = vld [vmem:[#allocation2 + $0x70] sm:$0xf]  ;;  %v733_v1 = vld [vmem:[#allocation2 + $0x74] sm:$0xf0] }
   0x7   :  { %v644_v2 = vld [vmem:[#allocation2 + $0xf0] sm:$0xf]  ;;  %v581_v3 = vor.u32 %v733_v1, %v580_v0  ;;  %v749_v4 = vld [vmem:[#allocation2 + $0xf4] sm:$0xf0]  ;;  %v732_v5 = vld [vmem:[#allocation2 + $0x74] sm:$0xf] }
   0x8   :  { %v582_v6 = vld [vmem:[#allocation2 + $0x78] sm:$0xf0]  ;;  %v645_v7 = vor.u32 %v749_v4, %v644_v2  ;;  %v748_v9 = vld [vmem:[#allocation2 + $0xf4] sm:$0xf]  ;;  %v572_v11 = vld [vmem:[#allocation2 + $0x60] sm:$0xf] }
   0x9   :  { %v585_v8 = vor.u32 %v732_v5, %v582_v6  ;;  %v646_v10 = vld [vmem:[#allocation2 + $0xf8] sm:$0xf0]  ;;  %233 = vmatpush.bf16.msra.mxu0 %v581_v3  ;;  %v731_v13 = vld [vmem:[#allocation2 + $0x64] sm:$0xf0]  ;;  %v636_v14 = vld [vmem:[#allocation2 + $0xe0] sm:$0xf] }
   0xa   :  { %v649_v12 = vor.u32 %v748_v9, %v646_v10  ;;  %v747_v15 = vld [vmem:[#allocation2 + $0xe4] sm:$0xf0]  ;;  %247 = vmatpush.bf16.msra.mxu1 %v645_v7  ;;  %v573_v16 = vor.u32 %v731_v13, %v572_v11  ;;  %v730_v18 = vld [vmem:[#allocation2 + $0x64] sm:$0xf]  ;;  %v574_v19 = vld [vmem:[#allocation2 + $0x68] sm:$0xf0] }
   0xb   :  { %261 = vmatpush.bf16.msra.mxu2 %v585_v8  ;;  %v637_v17 = vor.u32 %v747_v15, %v636_v14  ;;  %v746_v20 = vld [vmem:[#allocation2 + $0xe4] sm:$0xf]  ;;  %v577_v21 = vor.u32 %v730_v18, %v574_v19  ;;  %v638_v22 = vld [vmem:[#allocation2 + $0xe8] sm:$0xf0]  ;;  %v564_v23 = vld [vmem:[#allocation2 + $0x50] sm:$0xf] }
   0xc   :  { %275 = vmatpush.bf16.msra.mxu3 %v649_v12  ;;  %v729_v24 = vld [vmem:[#allocation2 + $0x54] sm:$0xf0]  ;;  %v641_v25 = vor.u32 %v746_v20, %v638_v22  ;;  %v628_v26 = vld [vmem:[#allocation2 + $0xd0] sm:$0xf]  ;;  %v728_v28 = vld [vmem:[#allocation2 + $0x54] sm:$0xf] }
   0xd   :  { %v745_v27 = vld [vmem:[#allocation2 + $0xd4] sm:$0xf0]  ;;  %234 = vmatpush.bf16.msra.mxu0 %v573_v16  ;;  %v565_v29 = vor.u32 %v729_v24, %v564_v23  ;;  %v566_v30 = vld [vmem:[#allocation2 + $0x58] sm:$0xf0]  ;;  %v744_v31 = vld [vmem:[#allocation2 + $0xd4] sm:$0xf] }
   0xe   :  { %v630_v32 = vld [vmem:[#allocation2 + $0xd8] sm:$0xf0]  ;;  %248 = vmatpush.bf16.msra.mxu1 %v637_v17  ;;  %v629_v33 = vor.u32 %v745_v27, %v628_v26  ;;  %v569_v34 = vor.u32 %v728_v28, %v566_v30  ;;  %v556_v35 = vld [vmem:[#allocation2 + $0x40] sm:$0xf]  ;;  %v727_v36 = vld [vmem:[#allocation2 + $0x44] sm:$0xf0] }
   0xf   :  { %262 = vmatpush.bf16.msra.mxu2 %v577_v21  ;;  %v620_v37 = vld [vmem:[#allocation2 + $0xc0] sm:$0xf]  ;;  %v633_v38 = vor.u32 %v744_v31, %v630_v32  ;;  %v743_v39 = vld [vmem:[#allocation2 + $0xc4] sm:$0xf0]  ;;  %v726_v40 = vld [vmem:[#allocation2 + $0x44] sm:$0xf]  ;;  %v557_v44 = vor.u32 %v727_v36, %v556_v35 }
  0x10   :  { %276 = vmatpush.bf16.msra.mxu3 %v641_v25  ;;  %v558_v41 = vld [vmem:[#allocation2 + $0x48] sm:$0xf0]  ;;  %v742_v42 = vld [vmem:[#allocation2 + $0xc4] sm:$0xf]  ;;  %v621_v45 = vor.u32 %v743_v39, %v620_v37  ;;  %v548_v47 = vld [vmem:[#allocation2 + $0x30] sm:$0xf] }
  0x11   :  { %v622_v43 = vld [vmem:[#allocation2 + $0xc8] sm:$0xf0]  ;;  %235 = vmatpush.bf16.msra.mxu0 %v565_v29  ;;  %v561_v46 = vor.u32 %v726_v40, %v558_v41  ;;  %v725_v48 = vld [vmem:[#allocation2 + $0x34] sm:$0xf0]  ;;  %v612_v49 = vld [vmem:[#allocation2 + $0xb0] sm:$0xf] }
  0x12   :  { %249 = vmatpush.bf16.msra.mxu1 %v629_v33  ;;  %v625_v50 = vor.u32 %v742_v42, %v622_v43  ;;  %v741_v51 = vld [vmem:[#allocation2 + $0xb4] sm:$0xf0]  ;;  %v724_v52 = vld [vmem:[#allocation2 + $0x34] sm:$0xf]  ;;  %v550_v53 = vld [vmem:[#allocation2 + $0x38] sm:$0xf0]  ;;  %v549_v56 = vor.u32 %v725_v48, %v548_v47 }
  0x13   :  { %263 = vmatpush.bf16.msra.mxu2 %v569_v34  ;;  %v740_v54 = vld [vmem:[#allocation2 + $0xb4] sm:$0xf]  ;;  %v614_v55 = vld [vmem:[#allocation2 + $0xb8] sm:$0xf0]  ;;  %v613_v57 = vor.u32 %v741_v51, %v612_v49  ;;  %v553_v58 = vor.u32 %v724_v52, %v550_v53  ;;  %v540_v59 = vld [vmem:[#allocation2 + $0x20] sm:$0xf] }
  0x14   :  { %277 = vmatpush.bf16.msra.mxu3 %v633_v38  ;;  %v723_v60 = vld [vmem:[#allocation2 + $0x24] sm:$0xf0]  ;;  %v604_v61 = vld [vmem:[#allocation2 + $0xa0] sm:$0xf]  ;;  %v617_v62 = vor.u32 %v740_v54, %v614_v55  ;;  %v722_v0 = vld [vmem:[#allocation2 + $0x24] sm:$0xf] }
  0x15   :  { %236 = vmatpush.bf16.msra.mxu0 %v557_v44  ;;  %v739_v63 = vld [vmem:[#allocation2 + $0xa4] sm:$0xf0]  ;;  %v542_v1 = vld [vmem:[#allocation2 + $0x28] sm:$0xf0]  ;;  %v738_v2 = vld [vmem:[#allocation2 + $0xa4] sm:$0xf]  ;;  %v541_v4 = vor.u32 %v723_v60, %v540_v59 }
  0x16   :  { %250 = vmatpush.bf16.msra.mxu1 %v621_v45  ;;  %v606_v3 = vld [vmem:[#allocation2 + $0xa8] sm:$0xf0]  ;;  %v605_v5 = vor.u32 %v739_v63, %v604_v61  ;;  %v545_v6 = vor.u32 %v722_v0, %v542_v1  ;;  %v532_v7 = vld [vmem:[#allocation2 + $0x10] sm:$0xf]  ;;  %v721_v8 = vld [vmem:[#allocation2 + $0x14] sm:$0xf0] }
  0x17   :  { %264 = vmatpush.bf16.msra.mxu2 %v561_v46  ;;  %v596_v9 = vld [vmem:[#allocation2 + $0x90] sm:$0xf]  ;;  %v609_v10 = vor.u32 %v738_v2, %v606_v3  ;;  %v737_v11 = vld [vmem:[#allocation2 + $0x94] sm:$0xf0]  ;;  %v720_v12 = vld [vmem:[#allocation2 + $0x14] sm:$0xf]  ;;  %v533_v16 = vor.u32 %v721_v8, %v532_v7 }
  0x18   :  { %278 = vmatpush.bf16.msra.mxu3 %v625_v50  ;;  %v534_v13 = vld [vmem:[#allocation2 + $0x18] sm:$0xf0]  ;;  %v736_v14 = vld [vmem:[#allocation2 + $0x94] sm:$0xf]  ;;  %v597_v17 = vor.u32 %v737_v11, %v596_v9  ;;  %v524_v19 = vld [vmem:[#allocation2] sm:$0xf] }
  0x19   :  { %237 = vmatpush.bf16.msra.mxu0 %v549_v56  ;;  %v598_v15 = vld [vmem:[#allocation2 + $0x98] sm:$0xf0]  ;;  %v537_v18 = vor.u32 %v720_v12, %v534_v13  ;;  %v719_v20 = vld [vmem:[#allocation2 + $0x4] sm:$0xf0]  ;;  %v588_v21 = vld [vmem:[#allocation2 + $0x80] sm:$0xf] }
  0x1a   :  { %251 = vmatpush.bf16.msra.mxu1 %v613_v57  ;;  %v601_v22 = vor.u32 %v736_v14, %v598_v15  ;;  %v735_v23 = vld [vmem:[#allocation2 + $0x84] sm:$0xf0]  ;;  %v718_v24 = vld [vmem:[#allocation2 + $0x4] sm:$0xf]  ;;  %v526_v25 = vld [vmem:[#allocation2 + $0x8] sm:$0xf0]  ;;  %v525_v28 = vor.u32 %v719_v20, %v524_v19 }
  0x1b   :  { %265 = vmatpush.bf16.msra.mxu2 %v553_v58  ;;  %v734_v26 = vld [vmem:[#allocation2 + $0x84] sm:$0xf]  ;;  %v590_v27 = vld [vmem:[#allocation2 + $0x88] sm:$0xf0]  ;;  %v37_v30 = vld [vmem:[%s1021_s0 + $0x10] sm:$0xff]  ;;  %v589_v31 = vor.u32 %v735_v23, %v588_v21  ;;  %v529_v32 = vor.u32 %v718_v24, %v526_v25  ;;  %vm435_vm0 = vcmask 523264  }
  0x1c   :  { %279 = vmatpush.bf16.msra.mxu3 %v617_v62  ;;  %v35_v29 = vld [vmem:[%s1021_s0] sm:$0xff]  ;;  %v36_v33 = vld [vmem:[%s1021_s0 + $0x8] sm:$0xff]  ;;  %v38_v34 = vld [vmem:[%s1021_s0 + $0x18] sm:$0xff]  ;;  %v593_v35 = vor.u32 %v734_v26, %v590_v27  ;;  %s509_s14 = sshll.u32 %s1025_s4, 4  ;;  %s832_s15 = smov 256   ;;  %s510_s14 = int_to_ptr.hbm [resolvable:$true] %s509_s14 }
  0x1d   :  { %238 = vmatpush.bf16.msra.mxu0 %v541_v4  ;;  %v39_v36 = vpack.c.bf16 %v37_v30, %v35_v29  ;;  %v310_v37 = vld [vmem:[%s1023_s2 + $0x78] sm:$0xff]  ;;  %v40_v38 = vpack.c.bf16 %v38_v34, %v36_v33  ;;  %v309_v39 = vld [vmem:[%s1023_s2 + $0x70] sm:$0xff]  ;;  %v308_v40 = vld [vmem:[%s1023_s2 + $0x68] sm:$0xff]  ;;  %s833_s16 = smov 16  }
  0x1e   :  { %252 = vmatpush.bf16.msra.mxu1 %v605_v5  ;;  %v307_v41 = vld [vmem:[%s1023_s2 + $0x60] sm:$0xff]  ;;  %v306_v42 = vld [vmem:[%s1023_s2 + $0x58] sm:$0xff]  ;;  %v305_v43 = vld [vmem:[%s1023_s2 + $0x50] sm:$0xff] }
  0x1f   :  { %266 = vmatpush.bf16.msra.mxu2 %v545_v6  ;;  %v304_v44 = vld [vmem:[%s1023_s2 + $0x48] sm:$0xff]  ;;  %v303_v45 = vld [vmem:[%s1023_s2 + $0x40] sm:$0xff]  ;;  %v302_v46 = vld [vmem:[%s1023_s2 + $0x38] sm:$0xff] }
  0x20   :  { %280 = vmatpush.bf16.msra.mxu3 %v609_v10  ;;  %v301_v47 = vld [vmem:[%s1023_s2 + $0x30] sm:$0xff]  ;;  %v300_v48 = vld [vmem:[%s1023_s2 + $0x28] sm:$0xff]  ;;  %v299_v49 = vld [vmem:[%s1023_s2 + $0x20] sm:$0xff] }
  0x21   :  { %239 = vmatpush.bf16.msra.mxu0 %v533_v16  ;;  %v298_v50 = vld [vmem:[%s1023_s2 + $0x18] sm:$0xff]  ;;  %v297_v51 = vld [vmem:[%s1023_s2 + $0x10] sm:$0xff]  ;;  %v296_v52 = vld [vmem:[%s1023_s2 + $0x8] sm:$0xff] }
  0x22   :  { %253 = vmatpush.bf16.msra.mxu1 %v597_v17  ;;  %v295_v53 = vld [vmem:[%s1023_s2] sm:$0xff]  ;;  %v764_v9 = vld [vmem:[%s1024_s3 + $0x6c] sm:$0xf0]  ;;  %v702_v12 = vld [vmem:[%s1024_s3 + $0x70] sm:$0xf0] }
  0x23   :  { %267 = vmatpush.bf16.msra.mxu2 %v537_v18  ;;  %v700_v8 = vld [vmem:[%s1024_s3 + $0x60] sm:$0xf]  ;;  %v762_v10 = vld [vmem:[%s1024_s3 + $0x64] sm:$0xf]  ;;  %v708_v13 = vld [vmem:[%s1024_s3 + $0x68] sm:$0xf] }
  0x24   :  { %281 = vmatpush.bf16.msra.mxu3 %v601_v22  ;;  %v701_v11 = vor.u32 %v764_v9, %v700_v8  ;;  %v765_v14 = vld [vmem:[%s1024_s3 + $0x74] sm:$0xf0]  ;;  %v705_v15 = vor.u32 %v762_v10, %v702_v12  ;;  %v684_v17 = vld [vmem:[%s1024_s3 + $0x40] sm:$0xf]  ;;  %v760_v18 = vld [vmem:[%s1024_s3 + $0x4c] sm:$0xf0] }
  0x25   :  { %240 = vmatpush.bf16.msra.mxu0 %v525_v28  ;;  %v709_v16 = vor.u32 %v765_v14, %v708_v13  ;;  %v758_v19 = vld [vmem:[%s1024_s3 + $0x44] sm:$0xf]  ;;  %v685_v20 = vor.u32 %v760_v18, %v684_v17  ;;  %v686_v21 = vld [vmem:[%s1024_s3 + $0x50] sm:$0xf0]  ;;  %v692_v22 = vld [vmem:[%s1024_s3 + $0x48] sm:$0xf] }
  0x26   :  { %254 = vmatpush.bf16.msra.mxu1 %v589_v31  ;;  %v761_v23 = vld [vmem:[%s1024_s3 + $0x54] sm:$0xf0]  ;;  %v689_v24 = vor.u32 %v758_v19, %v686_v21  ;;  %v668_v26 = vld [vmem:[%s1024_s3 + $0x20] sm:$0xf]  ;;  %v756_v27 = vld [vmem:[%s1024_s3 + $0x2c] sm:$0xf0] }
  0x27   :  { %268 = vmatpush.bf16.msra.mxu2 %v529_v32  ;;  %v693_v25 = vor.u32 %v761_v23, %v692_v22  ;;  %v754_v28 = vld [vmem:[%s1024_s3 + $0x24] sm:$0xf]  ;;  %v669_v29 = vor.u32 %v756_v27, %v668_v26  ;;  %v670_v30 = vld [vmem:[%s1024_s3 + $0x30] sm:$0xf0]  ;;  %v676_v31 = vld [vmem:[%s1024_s3 + $0x28] sm:$0xf] }
  0x28   :  { %282 = vmatpush.bf16.msra.mxu3 %v593_v35  ;;  %241 = vmatmul.bf16.vlgmr.msra.gmra.mxu0 %v39_v36  ;;  %v757_v32 = vld [vmem:[%s1024_s3 + $0x34] sm:$0xf0]  ;;  %v673_v33 = vor.u32 %v754_v28, %v670_v30  ;;  %v652_v35 = vld [vmem:[%s1024_s3] sm:$0xf] }
  0x29   :  { %311 = vmatpush.msrb.mxu0 %v310_v37  ;;  %255 = vmatmul.bf16.vlgmr.msra.gmra.mxu1 %v40_v38  ;;  %v677_v34 = vor.u32 %v757_v32, %v676_v31  ;;  %v750_v37 = vld [vmem:[%s1024_s3 + $0x4] sm:$0xf] }
  0x2a   :  { %269 = vmatmul.bf16.vlgmr.msra.gmra.mxu2 %v39_v36  ;;  %443 = vmatpush.bf16.msrb.mxu1 %v701_v11  ;;  %v752_v36 = vld [vmem:[%s1024_s3 + $0xc] sm:$0xf0] }
  0x2b   :  { %283 = vmatmul.bf16.vlgmr.msra.gmra.mxu3 %v40_v38  ;;  %312 = vmatpush.msrb.mxu0 %v309_v39  ;;  %v653_v38 = vor.u32 %v752_v36, %v652_v35  ;;  %v654_v39 = vld [vmem:[%s1024_s3 + $0x10] sm:$0xf0] }
  0x2c   :  { %457 = vmatpush.bf16.msrb.mxu2 %v705_v15  ;;  %471 = vmatpush.bf16.msrb.mxu3 %v709_v16 }
  0x2d   :  { %313 = vmatpush.msrb.mxu0 %v308_v40  ;;  %v660_v40 = vld [vmem:[%s1024_s3 + $0x8] sm:$0xf] }
  0x2e   :  { %444 = vmatpush.bf16.msrb.mxu1 %v685_v20 }
  0x2f   :  { %314 = vmatpush.msrb.mxu0 %v307_v41  ;;  %v753_v41 = vld [vmem:[%s1024_s3 + $0x14] sm:$0xf0] }
  0x30   :  { %458 = vmatpush.bf16.msrb.mxu2 %v689_v24  ;;  %472 = vmatpush.bf16.msrb.mxu3 %v693_v25 }
  0x31   :  { %315 = vmatpush.msrb.mxu0 %v306_v42  ;;  %v657_v42 = vor.u32 %v750_v37, %v654_v39 }
  0x32   :  { %445 = vmatpush.bf16.msrb.mxu1 %v669_v29 }
  0x33   :  { %316 = vmatpush.msrb.mxu0 %v305_v43  ;;  %v661_v43 = vor.u32 %v753_v41, %v660_v40 }
  0x34   :  { %459 = vmatpush.bf16.msrb.mxu2 %v673_v33  ;;  %473 = vmatpush.bf16.msrb.mxu3 %v677_v34 }
  0x35   :  { %317 = vmatpush.msrb.mxu0 %v304_v44  ;;  %v763_v44 = vld [vmem:[%s1024_s3 + $0x6c] sm:$0xf] }
  0x36   :  { %446 = vmatpush.bf16.msrb.mxu1 %v653_v38 }
  0x37   :  { %318 = vmatpush.msrb.mxu0 %v303_v45  ;;  %v710_v45 = vld [vmem:[%s1024_s3 + $0x78] sm:$0xf0] }
  0x38   :  { %460 = vmatpush.bf16.msrb.mxu2 %v657_v42  ;;  %474 = vmatpush.bf16.msrb.mxu3 %v661_v43 }
  0x39   :  { %319 = vmatpush.msrb.mxu0 %v302_v46  ;;  %v713_v46 = vor.u32 %v763_v44, %v710_v45 }
  0x3b   :  { %320 = vmatpush.msrb.mxu0 %v301_v47  ;;  %v759_v47 = vld [vmem:[%s1024_s3 + $0x4c] sm:$0xf]  ;;  %485 = vmatpush.bf16.msra.mxu1 %v713_v46 }
  0x3d   :  { %321 = vmatpush.msrb.mxu0 %v300_v48  ;;  %v694_v48 = vld [vmem:[%s1024_s3 + $0x58] sm:$0xf0] }
  0x3f   :  { %322 = vmatpush.msrb.mxu0 %v299_v49  ;;  %v697_v49 = vor.u32 %v759_v47, %v694_v48 }
  0x41   :  { %323 = vmatpush.msrb.mxu0 %v298_v50  ;;  %v755_v50 = vld [vmem:[%s1024_s3 + $0x2c] sm:$0xf]  ;;  %486 = vmatpush.bf16.msra.mxu1 %v697_v49 }
  0x43   :  { %324 = vmatpush.msrb.mxu0 %v297_v51  ;;  %v678_v51 = vld [vmem:[%s1024_s3 + $0x38] sm:$0xf0] }
  0x45   :  { %325 = vmatpush.msrb.mxu0 %v296_v52  ;;  %v681_v52 = vor.u32 %v755_v50, %v678_v51 }
  0x47   :  { %326 = vmatpush.msrb.mxu0 %v295_v53  ;;  %v751_v53 = vld [vmem:[%s1024_s3 + $0xc] sm:$0xf]  ;;  %487 = vmatpush.bf16.msra.mxu1 %v681_v52 }
  0xa5   :  { %v242_v54 = vpop.f32.mrf.mxu0 }
  0xa6   :  { %v256_v55 = vpop.f32.mrf.mxu1 }
  0xa7   :  { %v257_v56 = vadd.f32 %v256_v55, %v242_v54  ;;  %v662_v54 = vld [vmem:[%s1024_s3 + $0x18] sm:$0xf0]  ;;  %s831_s3 = smov [#allocation5]  }
  0xa8   :  { %s507_s11 = sshll.u32 %s831_s3, 4  ;;  %s508_s11 = int_to_ptr.vmem [resolvable:$true] %s507_s11 }
  0xa9   :  { %v289_v59 = vmul.f32 %v257_v56, %v257_v56  ;;  %v665_v56 = vor.u32 %v751_v53, %v662_v54 }
  0xab   :  { %488 = vmatpush.bf16.msra.mxu1 %v665_v56 }
  0xad   :  { %v270_v57 = vpop.f32.mrf.mxu2  ;;  %v244_v62 = vpop.f32.mrf.mxu0 }
  0xae   :  { %v284_v58 = vpop.f32.mrf.mxu3  ;;  %v258_v63 = vpop.f32.mrf.mxu1 }
  0xaf   :  { %v285_v60 = vadd.f32 %v284_v58, %v270_v57  ;;  %v259_v1 = vadd.f32 %v258_v63, %v244_v62 }
  0xb1   :  { %v291_v61 = vmul.f32 %v285_v60, %v285_v60  ;;  %v290_v5 = vmul.f32 %v259_v1, %v259_v1 }
  0xb3   :  { %v293_v0 = vadd.f32 %v291_v61, %v289_v59 }
  0xb5   :  { %327 = vmatmul.f32.vlgmr.msrb.gmra.mxu0 %v293_v0  ;;  %v272_v2 = vpop.f32.mrf.mxu2 }
  0xb6   :  { %v286_v3 = vpop.f32.mrf.mxu3 }
  0xb7   :  { %v287_v4 = vadd.f32 %v286_v3, %v272_v2 }
  0xb9   :  { %v292_v6 = vmul.f32 %v287_v4, %v287_v4 }
  0xbb   :  { %v294_v7 = vadd.f32 %v292_v6, %v290_v5 }
  0xbd   :  { %330 = vmatmul.f32.gmra.mxu0 %v294_v7 }
 0x132   :  { %v328_v55 = vpop.f32.mrf.mxu0 }
 0x133   :  { %v329_v57 = vadd.f32 0.0001, %v328_v55 }
 0x135   :  { %772 = vlog2.f32 %v329_v57 }
 0x13a   :  { %v331_v58 = vpop.f32.mrf.mxu0 }
 0x13b   :  { %v332_v59 = vadd.f32 0.0001, %v331_v58  ;;  %v773_v60 = vpop.eup %772 }
 0x13c   :  { %v335_v62 = vmul.f32 0.6931472, %v773_v60 }
 0x13d   :  { %774 = vlog2.f32 %v332_v59 }
 0x143   :  { %v775_v61 = vpop.eup %774 }
 0x144   :  { %v337_v63 = vmul.f32 0.6931472, %v775_v61 }
 0x146   :  { %v338_v0 = vpack.c.bf16 %v337_v63, %v335_v62 }
 0x148   :  { %714 = vmatmul.msk.bf16.vlgmr.msrb.gmra.mxu1 %vm435_vm0, %v338_v0  ;;  %715 = vmatmul.msk.bf16.vlgmr.msrb.gmra.mxu2 %vm435_vm0, %v338_v0 }
 0x149   :  { %716 = vmatmul.msk.bf16.vlgmr.msrb.gmra.mxu3 %vm435_vm0, %v338_v0 }
 0x158   :  { %717 = vmatmul.msk.bf16.vlgmr.msra.gmra.mxu1 %vm435_vm0, %v338_v0 }
 0x1c5   :  { %v448_v1 = vpop.f32.mrf.mxu1 }
 0x1cb   :  { %v462_v2 = vpop.f32.mrf.mxu2 }
 0x1cc   :  { %v495_v3 = vpack.c.bf16 %v462_v2, %v448_v1  ;;  %v476_v5 = vpop.f32.mrf.mxu3 }
 0x1cd   :  { %v450_v4 = vpop.f32.mrf.mxu1 }
 0x1ce   :  { %499 = vst [vmem:[#allocation5] sm:$0xff] %v495_v3 }
 0x1d3   :  { %v464_v6 = vpop.f32.mrf.mxu2 }
 0x1d4   :  { %v497_v7 = vpack.c.bf16 %v464_v6, %v450_v4  ;;  %v478_v10 = vpop.f32.mrf.mxu3 }
 0x1d5   :  { %v490_v8 = vpop.f32.mrf.mxu1 }
 0x1d6   :  { %501 = vst [vmem:[#allocation5 + $0x10] sm:$0xff] %v497_v7  ;;  %v496_v9 = vpack.c.bf16 %v490_v8, %v476_v5 }
 0x1d8   :  { %500 = vst [vmem:[#allocation5 + $0x8] sm:$0xff] %v496_v9 }
 0x1dd   :  { %v492_v11 = vpop.f32.mrf.mxu1 }
 0x1de   :  { %v498_v12 = vpack.c.bf16 %v492_v11, %v478_v10 }
 0x1e0   :  { %502 = vst [vmem:[#allocation5 + $0x18] sm:$0xff] %v498_v12 }
 0x1e1   :  { %515 = dma.vmem_to_hbm [thread:$0]  %s508_s11, 512, %s510_s14, [#allocation4], %s832_s15, %s832_s15, %s833_s16  }
 0x1e2   :  { %826 = dma.done.wait [#allocation4], 512  }
 0x1e3   :  { %827 = vsyncadd [#allocation4], 4294966784 }
 0x1e4   :  { %520 = vsyncpa [#allocation3], 1 }
 0x1e5   :  { %521 = vsyncpa [#allocation4], 1 }

</bundles_post_ra>
